<compile_context>
chip_gen: v5e
topology: v5e:2x2
jax: 0.10.0
libtpu: 0.0.40
codegen_flags: <defaults>
</compile_context>

<pallas_src>
from functools import partial

import jax
import jax.numpy as jnp
from jax.experimental import pallas as pl
from jax.experimental.pallas import tpu as pltpu


def _round_up(n, m):
    return ((n + m - 1) // m) * m


def qnetwork_kernel(x_ref, w1_ref, b1_ref, w2_ref, b2_ref, w3_ref, b3_ref,
                    out_ref):
    """One (features, TB) batch tile of the 3-layer MLP; operands are VMEM-resident."""
    cd = w1_ref.dtype                     # compute dtype (f32 or bf16), set by wrapper
    x = x_ref[...]                        # (S, TB), already in compute dtype

    # Layer 1: (H0,S)@(S,TB) -> (H0,TB).  f32 accumulate; bias/ReLU in f32.
    h1 = jnp.dot(w1_ref[...], x, preferred_element_type=jnp.float32) + b1_ref[...]
    h1 = jnp.maximum(h1, 0.0)

    # Layer 2: (H1,H0)@(H0,TB) -> (H1,TB).
    h2 = jnp.dot(w2_ref[...], h1.astype(cd),
                 preferred_element_type=jnp.float32) + b2_ref[...]
    h2 = jnp.maximum(h2, 0.0)

    # Output layer: (A_pad,H1)@(H1,TB) -> (A_pad,TB).  A_pad=8 -> sublane pad only.
    out = jnp.dot(w3_ref[...], h2.astype(cd),
                  preferred_element_type=jnp.float32) + b3_ref[...]
    out_ref[...] = out.astype(out_ref.dtype)


def prepare_params(params, *, use_bf16_matmul=False):
    """One-time prep (call at init / after weight updates, NOT per forward).

    params: PyTorch-layout dict: w{i} (out,in), b{i} (out,).
    Returns kernel-ready operands: output layer zero-padded to 8 rows, biases
    reshaped to (out,1) f32, weights optionally cast to bf16.
    """
    w_dt = jnp.bfloat16 if use_bf16_matmul else jnp.float32
    w3, b3 = params["w3"], params["b3"]
    A, H1 = w3.shape
    A_pad = _round_up(A, 8)                             # sublane pad only (e.g. 4 -> 8)
    w3p = jnp.zeros((A_pad, H1), w3.dtype).at[:A].set(w3)
    b3p = jnp.zeros((A_pad,), b3.dtype).at[:A].set(b3)
    return {
        "w1": params["w1"].astype(w_dt),
        "b1": params["b1"].reshape(-1, 1).astype(jnp.float32),
        "w2": params["w2"].astype(w_dt),
        "b2": params["b2"].reshape(-1, 1).astype(jnp.float32),
        "w3": w3p.astype(w_dt),
        "b3": b3p.reshape(-1, 1).astype(jnp.float32),
    }


@partial(jax.jit, static_argnames=("action_size", "block_b", "min_grid_steps"))
def qnetwork_forward(x, prepared, *, action_size, block_b=4096, min_grid_steps=1):
    """x: (B, state_size) float32.  prepared: output of prepare_params()."""
    w1, b1 = prepared["w1"], prepared["b1"]
    w2, b2 = prepared["w2"], prepared["b2"]
    w3, b3 = prepared["w3"], prepared["b3"]
    B, S = x.shape
    H0 = w1.shape[0]
    H1 = w2.shape[0]
    A_pad = w3.shape[0]

    # Batch tile: lane-aligned (multiple of 128), as large as block_b allows.
    TB = min(max(128, _round_up(block_b, 128)), _round_up(B, 128))
    if min_grid_steps > 1:
        # v7x: force >= min_grid_steps tiles so both TensorCores get work.
        TB = min(TB, max(128, _round_up(pl.cdiv(B, min_grid_steps), 128)))
    B_pad = _round_up(B, TB)
    grid = (B_pad // TB,)

    # Batch on lanes: present x^T (S, B_pad); padded columns are sliced off below.
    x_t = x.T.astype(w1.dtype)
    if B_pad != B:
        x_t = jnp.pad(x_t, ((0, 0), (0, B_pad - B)))

    def _const_spec(shape):
        # Constant block index -> DMA'd once, VMEM-resident across all grid steps.
        # TODO(synk): pipeline_mode=pl.Buffered(1) would drop the redundant second
        # buffer for these resident operands; omitted for portability.
        return pl.BlockSpec(shape, lambda i: (0, 0))

    in_specs = [
        pl.BlockSpec((S, TB), lambda i: (0, i)),        # x^T, pipelined over batch
        _const_spec(w1.shape), _const_spec(b1.shape),
        _const_spec(w2.shape), _const_spec(b2.shape),
        _const_spec(w3.shape), _const_spec(b3.shape),
    ]
    out_spec = pl.BlockSpec((A_pad, TB), lambda i: (0, i))

    itemsize = jnp.dtype(w1.dtype).itemsize
    flops = 2 * B_pad * (S * H0 + H0 * H1 + H1 * A_pad)
    bytes_accessed = (B_pad * S * itemsize            # x^T read
                      + B_pad * A_pad * 4             # out^T write
                      + (S * H0 + H0 * H1 + H1 * A_pad) * itemsize
                      + (H0 + H1 + A_pad) * 4)

    out_t = pl.pallas_call(
        qnetwork_kernel,
        out_shape=jax.ShapeDtypeStruct((A_pad, B_pad), jnp.float32),
        grid=grid,
        in_specs=in_specs,
        out_specs=out_spec,
        compiler_params=pltpu.CompilerParams(
            dimension_semantics=("parallel",),          # shard batch tiles on v7x
        ),
        cost_estimate=pl.CostEstimate(
            flops=flops, bytes_accessed=bytes_accessed, transcendentals=0),
    )(x_t, w1, b1, w2, b2, w3, b3)

    # Slice off padded action rows / padded batch columns, back to (B, A).
    return out_t[:action_size, :B].T


def init_params(key, state_size, action_size, hidden_sizes):
    """nn.Linear-style init (PyTorch layout): W (out,in), b (out,), U(+-1/sqrt(fan_in))."""
    h0, h1 = int(hidden_sizes[0]), int(hidden_sizes[1])
    dims = [(state_size, h0), (h0, h1), (h1, action_size)]
    params = {}
    keys = jax.random.split(key, 2 * len(dims))
    for i, (fan_in, fan_out) in enumerate(dims):
        bound = 1.0 / (fan_in ** 0.5)
        params[f"w{i+1}"] = jax.random.uniform(
            keys[2 * i], (fan_out, fan_in), jnp.float32, -bound, bound)
        params[f"b{i+1}"] = jax.random.uniform(
            keys[2 * i + 1], (fan_out,), jnp.float32, -bound, bound)
    return params


def _reference(x, params):
    h = jnp.maximum(x @ params["w1"].T + params["b1"], 0.0)
    h = jnp.maximum(h @ params["w2"].T + params["b2"], 0.0)
    return h @ params["w3"].T + params["b3"]


if __name__ == "__main__":
    # Small shapes consistent with the module: state -> hidden [64, 64] -> actions.
    batch = 8
    state_size = 8
    action_size = 4
    hidden_sizes = [64, 64]

    key = jax.random.PRNGKey(0)
    k_x, k_p, k_x2 = jax.random.split(key, 3)
    x = jax.random.normal(k_x, (batch, state_size), dtype=jnp.float32)
    params = init_params(k_p, state_size, action_size, hidden_sizes)

    # f32 path, single tile (small B -> one grid step).
    prep = prepare_params(params)
    q_values = qnetwork_forward(x, prep, action_size=action_size)
    jax.block_until_ready(q_values)
    ref = _reference(x, params)
    assert q_values.shape == (batch, action_size)
    assert jnp.allclose(q_values, ref, atol=1e-5, rtol=1e-5)

    # Multi-tile path: non-multiple batch exercises padding + the batch grid
    # (weights stay resident, x^T/out^T tiles are pipelined).
    big_b = 300
    x2 = jax.random.normal(k_x2, (big_b, state_size), dtype=jnp.float32)
    q2 = qnetwork_forward(x2, prep, action_size=action_size, block_b=128)
    jax.block_until_ready(q2)
    ref2 = _reference(x2, params)
    assert q2.shape == (big_b, action_size)
    assert jnp.allclose(q2, ref2, atol=1e-5, rtol=1e-5)

    # bf16-matmul path (inference-grade accuracy; f32 accumulate/bias/ReLU).
    prep_bf16 = prepare_params(params, use_bf16_matmul=True)
    q3 = qnetwork_forward(x2, prep_bf16, action_size=action_size)
    jax.block_until_ready(q3)
    assert q3.shape == (big_b, action_size)
    assert jnp.allclose(q3, ref2, atol=5e-2, rtol=5e-2)

    print("KERNEL_OK")
</pallas_src>

<mosaic_0001>
module attributes {stable_mosaic.version = 11 : i64} {
  func.func @qnetwork_kernel(%arg0: i32, %arg1: memref<8x128xf32, #tpu.memory_space<vmem>>, %arg2: memref<64x8xf32, #tpu.memory_space<vmem>>, %arg3: memref<64x1xf32, #tpu.memory_space<vmem>>, %arg4: memref<64x64xf32, #tpu.memory_space<vmem>>, %arg5: memref<64x1xf32, #tpu.memory_space<vmem>>, %arg6: memref<8x64xf32, #tpu.memory_space<vmem>>, %arg7: memref<8x1xf32, #tpu.memory_space<vmem>>, %arg8: memref<8x128xf32, #tpu.memory_space<vmem>>) attributes {dimension_semantics = [#tpu.dimension_semantics<parallel>], iteration_bounds = array<i64: 1>, scalar_prefetch = 0 : i64, scratch_operands = 0 : i64, tpu.core_type = #tpu.core_type<tc>, window_params = [{transform_indices = @transform_0, window_bounds = array<i64: 8, 128>}, {pipeline_mode = #tpu.pipeline_mode<synchronous>, transform_indices = @transform_1, window_bounds = array<i64: 64, 8>}, {pipeline_mode = #tpu.pipeline_mode<synchronous>, transform_indices = @transform_2, window_bounds = array<i64: 64, 1>}, {pipeline_mode = #tpu.pipeline_mode<synchronous>, transform_indices = @transform_3, window_bounds = array<i64: 64, 64>}, {pipeline_mode = #tpu.pipeline_mode<synchronous>, transform_indices = @transform_4, window_bounds = array<i64: 64, 1>}, {pipeline_mode = #tpu.pipeline_mode<synchronous>, transform_indices = @transform_5, window_bounds = array<i64: 8, 64>}, {pipeline_mode = #tpu.pipeline_mode<synchronous>, transform_indices = @transform_6, window_bounds = array<i64: 8, 1>}, {transform_indices = @transform_7, window_bounds = array<i64: 8, 128>}]} {
    %c0 = arith.constant 0 : index
    %c0_0 = arith.constant 0 : index
    %0 = vector.load %arg1[%c0, %c0_0] : memref<8x128xf32, #tpu.memory_space<vmem>>, vector<8x128xf32>
    %c0_1 = arith.constant 0 : index
    %c0_2 = arith.constant 0 : index
    %1 = vector.load %arg2[%c0_1, %c0_2] : memref<64x8xf32, #tpu.memory_space<vmem>>, vector<64x8xf32>
    %cst = arith.constant dense<0.000000e+00> : vector<64x128xf32>
    %2 = tpu.matmul %1, %0, %cst {dimension_numbers = #tpu.dot_dimension_numbers<[1], [0], [0], [1], [0, 0, 1, 1], [], []>} : vector<64x8xf32>, vector<8x128xf32>, vector<64x128xf32> -> vector<64x128xf32>
    %c0_3 = arith.constant 0 : index
    %c0_4 = arith.constant 0 : index
    %3 = vector.load %arg3[%c0_3, %c0_4] : memref<64x1xf32, #tpu.memory_space<vmem>>, vector<64x1xf32>
    %4 = vector.broadcast %3 : vector<64x1xf32> to vector<64x128xf32>
    %5 = arith.addf %2, %4 : vector<64x128xf32>
    %cst_5 = arith.constant 0.000000e+00 : f32
    %6 = vector.broadcast %cst_5 : f32 to vector<64x128xf32>
    %7 = arith.maximumf %5, %6 : vector<64x128xf32>
    %c0_6 = arith.constant 0 : index
    %c0_7 = arith.constant 0 : index
    %8 = vector.load %arg4[%c0_6, %c0_7] : memref<64x64xf32, #tpu.memory_space<vmem>>, vector<64x64xf32>
    %cst_8 = arith.constant dense<0.000000e+00> : vector<64x128xf32>
    %9 = tpu.matmul %8, %7, %cst_8 {dimension_numbers = #tpu.dot_dimension_numbers<[1], [0], [0], [1], [0, 0, 1, 1], [], []>} : vector<64x64xf32>, vector<64x128xf32>, vector<64x128xf32> -> vector<64x128xf32>
    %c0_9 = arith.constant 0 : index
    %c0_10 = arith.constant 0 : index
    %10 = vector.load %arg5[%c0_9, %c0_10] : memref<64x1xf32, #tpu.memory_space<vmem>>, vector<64x1xf32>
    %11 = vector.broadcast %10 : vector<64x1xf32> to vector<64x128xf32>
    %12 = arith.addf %9, %11 : vector<64x128xf32>
    %cst_11 = arith.constant 0.000000e+00 : f32
    %13 = vector.broadcast %cst_11 : f32 to vector<64x128xf32>
    %14 = arith.maximumf %12, %13 : vector<64x128xf32>
    %c0_12 = arith.constant 0 : index
    %c0_13 = arith.constant 0 : index
    %15 = vector.load %arg6[%c0_12, %c0_13] : memref<8x64xf32, #tpu.memory_space<vmem>>, vector<8x64xf32>
    %cst_14 = arith.constant dense<0.000000e+00> : vector<8x128xf32>
    %16 = tpu.matmul %15, %14, %cst_14 {dimension_numbers = #tpu.dot_dimension_numbers<[1], [0], [0], [1], [0, 0, 1, 1], [], []>} : vector<8x64xf32>, vector<64x128xf32>, vector<8x128xf32> -> vector<8x128xf32>
    %c0_15 = arith.constant 0 : index
    %c0_16 = arith.constant 0 : index
    %17 = vector.load %arg7[%c0_15, %c0_16] : memref<8x1xf32, #tpu.memory_space<vmem>>, vector<8x1xf32>
    %18 = vector.broadcast %17 : vector<8x1xf32> to vector<8x128xf32>
    %19 = arith.addf %16, %18 : vector<8x128xf32>
    %c0_17 = arith.constant 0 : index
    %c0_18 = arith.constant 0 : index
    %20 = vector.load %arg8[%c0_17, %c0_18] : memref<8x128xf32, #tpu.memory_space<vmem>>, vector<8x128xf32>
    tpu.vector_store %arg8[%c0_17, %c0_18], %19 {strides = array<i32>} : memref<8x128xf32, #tpu.memory_space<vmem>>, vector<8x128xf32>,
    return
  }
  func.func @transform_0(%arg0: i32) -> (i32, i32) {
    %c0_i32 = arith.constant 0 : i32
    %c0_i32_0 = arith.constant 0 : i32
    return %c0_i32, %arg0 : i32, i32
  }
  func.func @transform_1(%arg0: i32) -> (i32, i32) {
    %c0_i32 = arith.constant 0 : i32
    %c0_i32_0 = arith.constant 0 : i32
    %c0_i32_1 = arith.constant 0 : i32
    return %c0_i32, %c0_i32_0 : i32, i32
  }
  func.func @transform_2(%arg0: i32) -> (i32, i32) {
    %c0_i32 = arith.constant 0 : i32
    %c0_i32_0 = arith.constant 0 : i32
    %c0_i32_1 = arith.constant 0 : i32
    return %c0_i32, %c0_i32_0 : i32, i32
  }
  func.func @transform_3(%arg0: i32) -> (i32, i32) {
    %c0_i32 = arith.constant 0 : i32
    %c0_i32_0 = arith.constant 0 : i32
    %c0_i32_1 = arith.constant 0 : i32
    return %c0_i32, %c0_i32_0 : i32, i32
  }
  func.func @transform_4(%arg0: i32) -> (i32, i32) {
    %c0_i32 = arith.constant 0 : i32
    %c0_i32_0 = arith.constant 0 : i32
    %c0_i32_1 = arith.constant 0 : i32
    return %c0_i32, %c0_i32_0 : i32, i32
  }
  func.func @transform_5(%arg0: i32) -> (i32, i32) {
    %c0_i32 = arith.constant 0 : i32
    %c0_i32_0 = arith.constant 0 : i32
    %c0_i32_1 = arith.constant 0 : i32
    return %c0_i32, %c0_i32_0 : i32, i32
  }
  func.func @transform_6(%arg0: i32) -> (i32, i32) {
    %c0_i32 = arith.constant 0 : i32
    %c0_i32_0 = arith.constant 0 : i32
    %c0_i32_1 = arith.constant 0 : i32
    return %c0_i32, %c0_i32_0 : i32, i32
  }
  func.func @transform_7(%arg0: i32) -> (i32, i32) {
    %c0_i32 = arith.constant 0 : i32
    %c0_i32_0 = arith.constant 0 : i32
    return %c0_i32, %arg0 : i32, i32
  }
}

</mosaic_0001>

<bundles_post_ra>
// kernel: qnetwork_forward.1
= control target key start
LH: loop header
LB: loop body
LE: loop exit
PB: predicated region body
PF: predicated region fallthrough
CT: control target
= control target key end

     0   :  { %vm83_vm0 = vcmask 64512   ;;  %v352_v0 = vmov 0   ;;  %vm213_vm1 = vcmask 523264   ;;  %s518_s2 = inlined_call_operand.vmem [shape: f32[64,1], index: 2, kind: input, shape index: {}]   ;;  %s519_s0 = inlined_call_operand.vmem [shape: f32[8,128], index: 0, kind: input, shape index: {}]   ;;  %s520_s1 = inlined_call_operand.vmem [shape: f32[64,8], index: 1, kind: input, shape index: {}]   ;;  %s521_s4 = inlined_call_operand.vmem [shape: f32[64,1], index: 4, kind: input, shape index: {}]   ;;  %s522_s6 = inlined_call_operand.vmem [shape: f32[8,1], index: 6, kind: input, shape index: {}]   ;;  %s523_s3 = inlined_call_operand.vmem [shape: f32[64,64], index: 3, kind: input, shape index: {}]   ;;  %s524_s5 = inlined_call_operand.vmem [shape: f32[8,64], index: 5, kind: input, shape index: {}]   ;;  %s525_s7 = inlined_call_operand.vmem [shape: f32[8,128], index: 7, kind: output, shape index: {}]  }
   0x1   :  { %350 = vset.pattern.permute.xlu1 %v352_v0  ;;  %v40_v1 = vld [vmem:[%s518_s2 + $0x28] sm:$0xff]  ;;  %v26_v2 = vld [vmem:[%s519_s0] sm:$0xff]  ;;  %349 = vset.pattern.permute.xlu0 %v352_v0  ;;  %v42_v4 = vld [vmem:[%s518_s2 + $0x38] sm:$0xff] }
   0x2   :  { %v27_v3 = vld [vmem:[%s520_s1] sm:$0xff]  ;;  %70 = vperm.xlu1 %350, %v40_v1   ;;  %123 = vmatpush.msra.mxu0 %v26_v2  ;;  %v33_v5 = vld [vmem:[%s520_s1 + $0x30] sm:$0xff]  ;;  %v28_v7 = vld [vmem:[%s520_s1 + $0x8] sm:$0xff] }
   0x3   :  { %322 = vmatmul.msk.f32.vlgmr.msra.gmra.mxu0 %vm83_vm0, %v27_v3  ;;  %80 = vperm.xlu0 %349, %v42_v4   ;;  %v39_v6 = vld [vmem:[%s518_s2 + $0x20] sm:$0xff]  ;;  %v41_v8 = vld [vmem:[%s518_s2 + $0x30] sm:$0xff]  ;;  %v34_v9 = vld [vmem:[%s520_s1 + $0x38] sm:$0xff] }
   0x4   :  { %339 = vmatpush.msra.mxu2 %v26_v2  ;;  %351 = vset.pattern.permute.xlu2 %v352_v0  ;;  %v38_v10 = vld [vmem:[%s518_s2 + $0x18] sm:$0xff]  ;;  %v35_v11 = vld [vmem:[%s518_s2] sm:$0xff]  ;;  %v29_v12 = vld [vmem:[%s520_s1 + $0x10] sm:$0xff] }
   0x5   :  { %328 = vmatmul.msk.f32.vlgmr.msra.gmra.mxu2 %vm83_vm0, %v33_v5  ;;  %60 = vperm.xlu2 %351, %v38_v10   ;;  %v36_v13 = vld [vmem:[%s518_s2 + $0x8] sm:$0xff]  ;;  %v37_v14 = vld [vmem:[%s518_s2 + $0x10] sm:$0xff]  ;;  %v30_v16 = vld [vmem:[%s520_s1 + $0x18] sm:$0xff] }
   0x6   :  { %v170_v15 = vld [vmem:[%s521_s4 + $0x28] sm:$0xff]  ;;  %v171_v17 = vld [vmem:[%s521_s4 + $0x30] sm:$0xff]  ;;  %v172_v18 = vld [vmem:[%s521_s4 + $0x38] sm:$0xff] }
   0x7   :  { %v167_v19 = vld [vmem:[%s521_s4 + $0x10] sm:$0xff]  ;;  %v31_v20 = vld [vmem:[%s520_s1 + $0x20] sm:$0xff]  ;;  %v168_v21 = vld [vmem:[%s521_s4 + $0x18] sm:$0xff] }
   0x8   :  { %v169_v22 = vld [vmem:[%s521_s4 + $0x20] sm:$0xff]  ;;  %v32_v24 = vld [vmem:[%s520_s1 + $0x28] sm:$0xff]  ;;  %v159_v63 = vld [vmem:[%s523_s3 + $0x10] sm:$0xff] }
   0x9   :  { %v288_v23 = vld [vmem:[%s522_s6] sm:$0xff]  ;;  %v166_v26 = vld [vmem:[%s521_s4 + $0x8] sm:$0xff]  ;;  %v163_v0 = vld [vmem:[%s523_s3 + $0x30] sm:$0xff] }
   0xa   :  { %65 = vperm.xlu1 %350, %v39_v6   ;;  %v165_v25 = vld [vmem:[%s521_s4] sm:$0xff]  ;;  %v158_v61 = vld [vmem:[%s523_s3 + $0x8] sm:$0xff]  ;;  %v160_v1 = vld [vmem:[%s523_s3 + $0x18] sm:$0xff] }
   0xb   :  { %323 = vmatmul.msk.f32.gmra.mxu0 %vm83_vm0, %v28_v7  ;;  %75 = vperm.xlu0 %349, %v41_v8   ;;  %v157_v59 = vld [vmem:[%s523_s3] sm:$0xff]  ;;  %v162_v62 = vld [vmem:[%s523_s3 + $0x28] sm:$0xff]  ;;  %v164_v2 = vld [vmem:[%s523_s3 + $0x38] sm:$0xff] }
   0xc   :  { %v161_v60 = vld [vmem:[%s523_s3 + $0x20] sm:$0xff] }
   0xd   :  { %329 = vmatmul.msk.f32.gmra.mxu2 %vm83_vm0, %v34_v9  ;;  %55 = vperm.xlu2 %351, %v37_v14  }
  0x12   :  { %45 = vperm.xlu1 %350, %v35_v11  }
  0x13   :  { %324 = vmatmul.msk.f32.gmra.mxu0 %vm83_vm0, %v29_v12  ;;  %50 = vperm.xlu0 %349, %v36_v13  }
  0x15   :  { %210 = vperm.xlu2 %351, %v172_v18  }
  0x1a   :  { %200 = vperm.xlu1 %350, %v170_v15  }
  0x1b   :  { %325 = vmatmul.msk.f32.gmra.mxu0 %vm83_vm0, %v30_v16  ;;  %205 = vperm.xlu0 %349, %v171_v17  }
  0x1d   :  { %195 = vperm.xlu2 %351, %v169_v22  }
  0x22   :  { %185 = vperm.xlu1 %350, %v167_v19  }
  0x23   :  { %326 = vmatmul.msk.f32.gmra.mxu0 %vm83_vm0, %v31_v20  ;;  %190 = vperm.xlu0 %349, %v168_v21  }
  0x25   :  { %180 = vperm.xlu2 %351, %v166_v26  }
  0x2a   :  { %291 = vperm.xlu1 %350, %v288_v23  }
  0x2b   :  { %327 = vmatmul.msk.f32.gmra.mxu0 %vm83_vm0, %v32_v24  ;;  %175 = vperm.xlu0 %349, %v165_v25  }
  0x5f   :  { %v61_v41 = vpop.permute.xlu2 %60 }
  0x67   :  { %v56_v48 = vpop.permute.xlu2 %55 }
  0x6f   :  { %v211_v7 = vpop.permute.xlu2 %210 }
  0x74   :  { %v71_v39 = vpop.permute.xlu1 %70 }
  0x75   :  { %v81_v28 = vpop.permute.xlu0 %80 }
  0x77   :  { %v196_v12 = vpop.permute.xlu2 %195 }
  0x7c   :  { %v66_v42 = vpop.permute.xlu1 %65 }
  0x7d   :  { %v76_v31 = vpop.permute.xlu0 %75 }
  0x80   :  { %v125_v27 = vpop.f32.mrf.mxu0 }
  0x84   :  { %v46_v51 = vpop.permute.xlu1 %45 }
  0x85   :  { %v51_v52 = vpop.permute.xlu0 %50  ;;  %v126_v55 = vadd.f32 %v125_v27, %v46_v51  ;;  %v181_v27 = vpop.permute.xlu2 %180 }
  0x87   :  { %v149_v58 = vmax.f32 %v126_v55, 0.0 }
  0x88   :  { %v128_v29 = vpop.f32.mrf.mxu0  ;;  %v143_v30 = vpop.f32.mrf.mxu2 }
  0x89   :  { %v144_v32 = vadd.f32 %v143_v30, %v76_v31  ;;  %v129_v53 = vadd.f32 %v128_v29, %v51_v52 }
  0x8b   :  { %v155_v36 = vmax.f32 %v144_v32, 0.0  ;;  %v150_v57 = vmax.f32 %v129_v53, 0.0 }
  0x8c   :  { %v201_v11 = vpop.permute.xlu1 %200 }
  0x8d   :  { %v206_v8 = vpop.permute.xlu0 %205 }
  0x90   :  { %v131_v33 = vpop.f32.mrf.mxu0  ;;  %v146_v34 = vpop.f32.mrf.mxu2 }
  0x91   :  { %v147_v35 = vadd.f32 %v146_v34, %v81_v28  ;;  %v132_v49 = vadd.f32 %v131_v33, %v56_v48 }
  0x93   :  { %v156_v37 = vmax.f32 %v147_v35, 0.0  ;;  %v151_v56 = vmax.f32 %v132_v49, 0.0  ;;  %v287_v35 = vld [vmem:[%s524_s5] sm:$0xff] }
  0x94   :  { %v186_v24 = vpop.permute.xlu1 %185 }
  0x95   :  { %246 = vmatpush.msra.mxu1 %v156_v37  ;;  %340 = vmatpush.msra.mxu3 %v156_v37  ;;  %v191_v16 = vpop.permute.xlu0 %190 }
  0x97   :  { %247 = vmatpush.msra.mxu1 %v155_v36  ;;  %341 = vmatpush.msra.mxu3 %v155_v36 }
  0x98   :  { %v134_v38 = vpop.f32.mrf.mxu0 }
  0x99   :  { %v135_v46 = vadd.f32 %v134_v38, %v61_v41 }
  0x9b   :  { %v152_v54 = vmax.f32 %v135_v46, 0.0 }
  0x9c   :  { %v292_v36 = vpop.permute.xlu1 %291 }
  0x9d   :  { %v176_v30 = vpop.permute.xlu0 %175 }
  0xa0   :  { %v137_v40 = vpop.f32.mrf.mxu0 }
  0xa1   :  { %v138_v44 = vadd.f32 %v137_v40, %v66_v42 }
  0xa3   :  { %v153_v50 = vmax.f32 %v138_v44, 0.0 }
  0xa8   :  { %v140_v43 = vpop.f32.mrf.mxu0 }
  0xa9   :  { %v141_v45 = vadd.f32 %v140_v43, %v71_v39 }
  0xab   :  { %v154_v47 = vmax.f32 %v141_v45, 0.0 }
  0xad   :  { %248 = vmatpush.msra.mxu1 %v154_v47  ;;  %342 = vmatpush.msra.mxu3 %v154_v47 }
  0xaf   :  { %249 = vmatpush.msra.mxu1 %v153_v50  ;;  %343 = vmatpush.msra.mxu3 %v153_v50 }
  0xb1   :  { %250 = vmatpush.msra.mxu1 %v152_v54  ;;  %344 = vmatpush.msra.mxu3 %v152_v54 }
  0xb3   :  { %251 = vmatpush.msra.mxu1 %v151_v56  ;;  %345 = vmatpush.msra.mxu3 %v151_v56 }
  0xb5   :  { %252 = vmatpush.msra.mxu1 %v150_v57  ;;  %346 = vmatpush.msra.mxu3 %v150_v57 }
  0xb7   :  { %253 = vmatpush.msra.mxu1 %v149_v58  ;;  %347 = vmatpush.msra.mxu3 %v149_v58 }
  0xb8   :  { %330 = vmatmul.msk.f32.vlgmr.msra.gmra.mxu1 %vm213_vm1, %v157_v59  ;;  %334 = vmatmul.msk.f32.vlgmr.msra.gmra.mxu3 %vm213_vm1, %v161_v60 }
  0xc0   :  { %331 = vmatmul.msk.f32.gmra.mxu1 %vm213_vm1, %v158_v61  ;;  %335 = vmatmul.msk.f32.gmra.mxu3 %vm213_vm1, %v162_v62 }
  0xc8   :  { %332 = vmatmul.msk.f32.gmra.mxu1 %vm213_vm1, %v159_v63  ;;  %336 = vmatmul.msk.f32.gmra.mxu3 %vm213_vm1, %v163_v0 }
  0xd0   :  { %333 = vmatmul.msk.f32.gmra.mxu1 %vm213_vm1, %v160_v1  ;;  %337 = vmatmul.msk.f32.gmra.mxu3 %vm213_vm1, %v164_v2 }
 0x135   :  { %v255_v3 = vpop.f32.mrf.mxu1 }
 0x136   :  { %v256_v31 = vadd.f32 %v255_v3, %v176_v30 }
 0x138   :  { %v279_v34 = vmax.f32 %v256_v31, 0.0 }
 0x13b   :  { %v267_v4 = vpop.f32.mrf.mxu3 }
 0x13c   :  { %v268_v20 = vadd.f32 %v267_v4, %v196_v12 }
 0x13d   :  { %v258_v5 = vpop.f32.mrf.mxu1 }
 0x13e   :  { %v283_v25 = vmax.f32 %v268_v20, 0.0  ;;  %v259_v28 = vadd.f32 %v258_v5, %v181_v27 }
 0x140   :  { %v280_v33 = vmax.f32 %v259_v28, 0.0 }
 0x143   :  { %v270_v6 = vpop.f32.mrf.mxu3 }
 0x144   :  { %v271_v17 = vadd.f32 %v270_v6, %v201_v11 }
 0x145   :  { %v261_v10 = vpop.f32.mrf.mxu1 }
 0x146   :  { %v284_v22 = vmax.f32 %v271_v17, 0.0  ;;  %v262_v26 = vadd.f32 %v261_v10, %v186_v24 }
 0x148   :  { %v281_v32 = vmax.f32 %v262_v26, 0.0 }
 0x14b   :  { %v273_v9 = vpop.f32.mrf.mxu3 }
 0x14c   :  { %v274_v14 = vadd.f32 %v273_v9, %v206_v8 }
 0x14d   :  { %v264_v19 = vpop.f32.mrf.mxu1 }
 0x14e   :  { %v285_v21 = vmax.f32 %v274_v14, 0.0  ;;  %v265_v23 = vadd.f32 %v264_v19, %v191_v16 }
 0x150   :  { %v282_v29 = vmax.f32 %v265_v23, 0.0 }
 0x153   :  { %v276_v13 = vpop.f32.mrf.mxu3 }
 0x154   :  { %v277_v15 = vadd.f32 %v276_v13, %v211_v7 }
 0x156   :  { %v286_v18 = vmax.f32 %v277_v15, 0.0 }
 0x158   :  { %305 = vmatpush.msrb.mxu2 %v286_v18 }
 0x15a   :  { %306 = vmatpush.msrb.mxu2 %v285_v21 }
 0x15c   :  { %307 = vmatpush.msrb.mxu2 %v284_v22 }
 0x15e   :  { %308 = vmatpush.msrb.mxu2 %v283_v25 }
 0x160   :  { %309 = vmatpush.msrb.mxu2 %v282_v29 }
 0x162   :  { %310 = vmatpush.msrb.mxu2 %v281_v32 }
 0x164   :  { %311 = vmatpush.msrb.mxu2 %v280_v33 }
 0x166   :  { %312 = vmatpush.msrb.mxu2 %v279_v34 }
 0x167   :  { %338 = vmatmul.msk.f32.vlgmr.msrb.gmra.mxu2 %vm213_vm1, %v287_v35 }
 0x1ea   :  { %v314_v37 = vpop.f32.mrf.mxu2 }
 0x1eb   :  { %v315_v38 = vadd.f32 %v314_v37, %v292_v36 }
 0x1ed   :  { %317 = vst [vmem:[%s525_s7] sm:$0xff] %v315_v38 }

</bundles_post_ra>
